<compile_context>
chip_gen: v7x
topology: tpu7x:2x2x1
jax: 0.10.0
libtpu: 0.0.40
codegen_flags: <defaults>
</compile_context>

<pallas_src>
import functools

import jax
import jax.numpy as jnp
import numpy as np
from jax import lax
from jax.experimental import pallas as pl
from jax.experimental.pallas import tpu as pltpu

_LANE = 128
_SUBLANE = 8
_CHUNK_ROWS = 64                       # vreg-resident mem chunk: 64 rows = 8 f32 vregs
_BLOCK_PAIR_BYTES = 4 * 1024 * 1024    # budget for (input block + output block) per grid step
_MIN_GRID_STEPS = 4                    # keep several blocks: megacore + DMA overlap
_VMEM_LIMIT_BYTES = 32 * 1024 * 1024   # explicit scoped-VMEM limit (safe on v5e/v6e/v7x)


def _lif_kernel(x_ref, o_ref, *, thresh, tau, chunk, t_unroll):
    """x_ref / o_ref: (T, TM, 128).  Membrane potential is a fori_loop carry (vregs)."""
    T, rows, _ = x_ref.shape
    n_chunks = rows // chunk

    def chunk_body(c, carry):
        r0 = c * chunk
        if chunk % _SUBLANE == 0:
            r0 = pl.multiple_of(r0, _SUBLANE)

        # t = 0 peeled: mem starts at zero, so mem = x[0] (no zeros store, no tau mul).
        mem = x_ref[0, pl.ds(r0, chunk), :].astype(jnp.float32)
        spike = mem >= thresh                              # ZDSPIKE forward
        o_ref[0, pl.ds(r0, chunk), :] = spike.astype(o_ref.dtype)
        mem = jnp.where(spike, jnp.float32(0.0), mem)      # hard reset

        def t_body(t, mem):
            mem = mem * tau + x_ref[t, pl.ds(r0, chunk), :].astype(jnp.float32)
            spike = mem >= thresh
            o_ref[t, pl.ds(r0, chunk), :] = spike.astype(o_ref.dtype)
            return jnp.where(spike, jnp.float32(0.0), mem)

        lax.fori_loop(1, T, t_body, mem, unroll=t_unroll)
        return carry

    lax.fori_loop(0, n_chunks, chunk_body, 0)


def lif_spike_forward(x, *, T=1, thresh=1.0, tau=0.5, out_dtype=None):
    """LIFSpike forward.  x: (T*B, C, H, W).  Returns {0,1} spikes, same shape.

    `out_dtype` may be jnp.bfloat16 (bit-exact for spikes) or jnp.int8 to cut
    HBM write traffic if the consumer allows; default matches x.dtype.
    """
    orig_shape = x.shape
    assert orig_shape[0] % T == 0, "leading dim must be divisible by T"
    in_dtype = jnp.dtype(x.dtype)
    out_dtype = in_dtype if out_dtype is None else jnp.dtype(out_dtype)

    flat = x.reshape(T, -1)                       # (T, N) time-major
    N = flat.shape[1]

    # Pad the lane axis only when N is not already a multiple of 128.
    M = -(-N // _LANE)                            # ceil(N / 128) feature rows
    Np = M * _LANE
    pad = Np - N
    if pad:
        flat = jnp.pad(flat, ((0, 0), (0, pad)))
    xr = flat.reshape(T, M, _LANE)

    # --- tile selection: dtype/T-aware budget, keep several grid steps ---
    per_row_bytes = T * _LANE * (in_dtype.itemsize + out_dtype.itemsize)
    max_rows = max(_SUBLANE, _BLOCK_PAIR_BYTES // per_row_bytes)
    max_rows = (max_rows // _SUBLANE) * _SUBLANE

    if M < _SUBLANE:
        TM = M                                    # block equals full sublane extent
        chunk = TM
    else:
        rows_for_split = -(-M // _MIN_GRID_STEPS)
        rows_for_split = -(-rows_for_split // _SUBLANE) * _SUBLANE
        TM = max(_SUBLANE, min(max_rows, rows_for_split))
        if TM >= _CHUNK_ROWS:
            TM = (TM // _CHUNK_ROWS) * _CHUNK_ROWS
            chunk = _CHUNK_ROWS
        else:
            chunk = TM

    grid_m = -(-M // TM)      # partial last block handled by Pallas masking

    kernel = functools.partial(
        _lif_kernel, thresh=float(thresh), tau=float(tau),
        chunk=chunk, t_unroll=min(4, T))

    bytes_accessed = int(T * Np * (in_dtype.itemsize + out_dtype.itemsize))
    out = pl.pallas_call(
        kernel,
        out_shape=jax.ShapeDtypeStruct((T, M, _LANE), out_dtype),
        grid_spec=pltpu.PrefetchScalarGridSpec(
            num_scalar_prefetch=0,
            grid=(grid_m,),
            in_specs=[pl.BlockSpec((T, TM, _LANE), lambda m: (0, m, 0))],
            out_specs=pl.BlockSpec((T, TM, _LANE), lambda m: (0, m, 0)),
        ),
        compiler_params=pltpu.CompilerParams(
            dimension_semantics=("parallel",),    # feature blocks are independent
            vmem_limit_bytes=_VMEM_LIMIT_BYTES,
        ),
        cost_estimate=pl.CostEstimate(
            flops=int(4 * T * Np),
            transcendentals=0,
            bytes_accessed=bytes_accessed,
        ),
    )(xr)

    out = out.reshape(T, Np)
    if pad:
        out = out[:, :N]
    return out.reshape(orig_shape)


def _lif_reference(x, *, T, thresh, tau):
    """Plain-JAX reference mirroring the PyTorch loop."""
    if T == 1:
        return (x - thresh >= 0.0).astype(x.dtype)
    xr = x.reshape(T, -1, *x.shape[1:])
    mem = jnp.zeros_like(xr[0])
    spikes = []
    for t in range(T):
        mem = mem * tau + xr[t]
        spike = (mem - thresh >= 0.0).astype(x.dtype)
        spikes.append(spike)
        mem = mem * (1.0 - spike)
    return jnp.stack(spikes, 0).reshape(x.shape)


if __name__ == "__main__":
    key = jax.random.PRNGKey(0)

    # --- T == 1 path (module defaults), batch=2 channels=4 spatial=16 ---
    x1 = jax.random.normal(key, (2, 4, 16, 16), dtype=jnp.float32) * 2.0
    out1 = jax.block_until_ready(lif_spike_forward(x1, T=1, thresh=1.0, tau=0.5))
    ref1 = _lif_reference(x1, T=1, thresh=1.0, tau=0.5)
    np.testing.assert_allclose(np.asarray(out1), np.asarray(ref1), atol=0.0)

    # narrow-IO output (bf16 spikes are bit-exact {0,1})
    out1b = jax.block_until_ready(
        lif_spike_forward(x1, T=1, thresh=1.0, tau=0.5, out_dtype=jnp.bfloat16))
    np.testing.assert_allclose(np.asarray(out1b).astype(np.float32),
                               np.asarray(ref1), atol=0.0)

    # --- T > 1 path: leading dim is T*B ---
    T, B, C, H, W = 2, 2, 4, 16, 16
    x2 = jax.random.normal(jax.random.PRNGKey(1), (T * B, C, H, W), dtype=jnp.float32) * 2.0
    out2 = jax.block_until_ready(lif_spike_forward(x2, T=T, thresh=1.0, tau=0.5))
    ref2 = _lif_reference(x2, T=T, thresh=1.0, tau=0.5)
    np.testing.assert_allclose(np.asarray(out2), np.asarray(ref2), atol=0.0)

    # --- ragged feature axis (N not a multiple of 128): exercises the pad path ---
    x3 = jax.random.normal(jax.random.PRNGKey(2), (2, 3, 5, 7), dtype=jnp.float32) * 2.0
    out3 = jax.block_until_ready(lif_spike_forward(x3, T=2, thresh=1.0, tau=0.5))
    ref3 = _lif_reference(x3, T=2, thresh=1.0, tau=0.5)
    np.testing.assert_allclose(np.asarray(out3), np.asarray(ref3), atol=0.0)

    print("KERNEL_OK")
</pallas_src>

<mosaic_0001>
module attributes {stable_mosaic.version = 11 : i64} {
  func.func @_lif_kernel(%arg0: i32, %arg1: memref<1x8x128xf32, #tpu.memory_space<vmem>>, %arg2: memref<1x8x128xf32, #tpu.memory_space<vmem>>) attributes {dimension_semantics = [#tpu.dimension_semantics<parallel>], iteration_bounds = array<i64: 2>, scalar_prefetch = 0 : i64, scratch_operands = 0 : i64, tpu.core_type = #tpu.core_type<tc>, window_params = [{transform_indices = @transform_0, window_bounds = array<i64: 1, 8, 128>}, {transform_indices = @transform_1, window_bounds = array<i64: 1, 8, 128>}]} {
    %c0_i32 = arith.constant 0 : i32
    %c8_i32 = arith.constant 8 : i32
    %0 = arith.muli %c0_i32, %c8_i32 : i32
    %1 = tpu.assume_multiple %0, 8 : i32
    %c0 = arith.constant 0 : index
    %2 = arith.index_cast %1 : i32 to index
    %c0_0 = arith.constant 0 : index
    %3 = vector.load %arg1[%c0, %2, %c0_0] : memref<1x8x128xf32, #tpu.memory_space<vmem>>, vector<1x8x128xf32>
    %4 = vector.shape_cast %3 : vector<1x8x128xf32> to vector<8x128xf32>
    %cst = arith.constant 1.000000e+00 : f32
    %5 = vector.broadcast %cst : f32 to vector<8x128xf32>
    %6 = arith.cmpf oge, %4, %5 : vector<8x128xf32>
    %7 = arith.extui %6 : vector<8x128xi1> to vector<8x128xi32>
    %8 = arith.sitofp %7 : vector<8x128xi32> to vector<8x128xf32>
    %c0_1 = arith.constant 0 : index
    %9 = arith.index_cast %1 : i32 to index
    %c0_2 = arith.constant 0 : index
    %10 = vector.load %arg2[%c0_1, %9, %c0_2] : memref<1x8x128xf32, #tpu.memory_space<vmem>>, vector<1x8x128xf32>
    %11 = vector.shape_cast %10 : vector<1x8x128xf32> to vector<8x128xf32>
    %12 = vector.shape_cast %8 : vector<8x128xf32> to vector<1x8x128xf32>
    tpu.vector_store %arg2[%c0_1, %9, %c0_2], %12 {strides = array<i32>} : memref<1x8x128xf32, #tpu.memory_space<vmem>>, vector<1x8x128xf32>,
    %cst_3 = arith.constant 0.000000e+00 : f32
    %13 = vector.broadcast %cst_3 : f32 to vector<8x128xf32>
    %14 = arith.select %6, %13, %4 : vector<8x128xi1>, vector<8x128xf32>
    %c1_i32 = arith.constant 1 : i32
    %c0_i32_4 = arith.constant 0 : i32
    %15 = arith.addi %c1_i32, %c0_i32_4 : i32
    %c1_i32_5 = arith.constant 1 : i32
    %16 = scf.for %arg3 = %c1_i32 to %15 step %c1_i32_5 iter_args(%arg4 = %14) -> (vector<8x128xf32>)  : i32 {
      %cst_8 = arith.constant 5.000000e-01 : f32
      %17 = vector.broadcast %cst_8 : f32 to vector<8x128xf32>
      %18 = arith.mulf %arg4, %17 : vector<8x128xf32>
      %19 = arith.index_cast %arg3 : i32 to index
      %20 = arith.index_cast %1 : i32 to index
      %c0_9 = arith.constant 0 : index
      %21 = vector.load %arg1[%19, %20, %c0_9] : memref<1x8x128xf32, #tpu.memory_space<vmem>>, vector<1x8x128xf32>
      %22 = vector.shape_cast %21 : vector<1x8x128xf32> to vector<8x128xf32>
      %23 = arith.addf %18, %22 : vector<8x128xf32>
      %cst_10 = arith.constant 1.000000e+00 : f32
      %24 = vector.broadcast %cst_10 : f32 to vector<8x128xf32>
      %25 = arith.cmpf oge, %23, %24 : vector<8x128xf32>
      %26 = arith.extui %25 : vector<8x128xi1> to vector<8x128xi32>
      %27 = arith.sitofp %26 : vector<8x128xi32> to vector<8x128xf32>
      %28 = arith.index_cast %arg3 : i32 to index
      %29 = arith.index_cast %1 : i32 to index
      %c0_11 = arith.constant 0 : index
      %30 = vector.load %arg2[%28, %29, %c0_11] : memref<1x8x128xf32, #tpu.memory_space<vmem>>, vector<1x8x128xf32>
      %31 = vector.shape_cast %30 : vector<1x8x128xf32> to vector<8x128xf32>
      %32 = vector.shape_cast %27 : vector<8x128xf32> to vector<1x8x128xf32>
      tpu.vector_store %arg2[%28, %29, %c0_11], %32 {strides = array<i32>} : memref<1x8x128xf32, #tpu.memory_space<vmem>>, vector<1x8x128xf32>,
      %cst_12 = arith.constant 0.000000e+00 : f32
      %33 = vector.broadcast %cst_12 : f32 to vector<8x128xf32>
      %34 = arith.select %25, %33, %23 : vector<8x128xi1>, vector<8x128xf32>
      scf.yield %34 : vector<8x128xf32>
    }
    %c0_i32_6 = arith.constant 0 : i32
    %c1_i32_7 = arith.constant 1 : i32
    return
  }
  func.func @transform_0(%arg0: i32) -> (i32, i32, i32) {
    %c0_i32 = arith.constant 0 : i32
    %c0_i32_0 = arith.constant 0 : i32
    %c0_i32_1 = arith.constant 0 : i32
    return %c0_i32, %arg0, %c0_i32_0 : i32, i32, i32
  }
  func.func @transform_1(%arg0: i32) -> (i32, i32, i32) {
    %c0_i32 = arith.constant 0 : i32
    %c0_i32_0 = arith.constant 0 : i32
    %c0_i32_1 = arith.constant 0 : i32
    return %c0_i32, %arg0, %c0_i32_0 : i32, i32, i32
  }
}

</mosaic_0001>

<bundles_post_ra>
// kernel: tpu_custom_call.1
= control target key start
LH: loop header
LB: loop body
LE: loop exit
PB: predicated region body
PF: predicated region fallthrough
CT: control target
= control target key end

     0   :  { %6 = vsyncpa [#allocation3], 0  ;;  %s553_s0 = inlined_call_operand.hbm [shape: f32[1,16,128], index: 0, kind: input, shape index: {}]   ;;  %s554_s1 = inlined_call_operand.hbm [shape: f32[1,16,128], index: 1, kind: output, shape index: {}]  }
   0x1   :  { %8 = vsyncpa [#allocation3 + $0x1], 0 }
   0x2   :  { %9 = vsyncpa [#allocation4], 0 }
   0x3   :  { %11 = vsyncpa [#allocation4 + $0x1], 0  ;;  %s392_s6 = smov 0   ;;  %s394_s7 = smov 0  }
   0x4   :  { %s396_s8 = smov 0   ;;  %s398_s9 = smov 0  }
   0x5 LB: > { %s413_s10 = sadd.s32 4294967295, %s377_s9   ;;  %s221_s11 = sadd.s32 4294967294, %s377_s9   ;;  %s377_s9 = sphi %s398_s9, %s569_s9   ;;  %s373_s8 = sphi %s396_s8, %s568_s8   ;;  %s369_s7 = sphi %s394_s7, %s567_s7   ;;  %s365_s6 = sphi %s392_s6, %s566_s6  }
   0x6   : > { %s417_s12 = sadd.s32 1, %s377_s9   ;;  %s24_s13 = sadd.s32 1, %s373_s8 }
   0x7   : > { %s21_s14 = ssub.s32 %s377_s9, %s417_s12  ;;  %p31_p0 = scmp.ne.s32.totalorder %s373_s8, %s369_s7 }
   0x8   : > { %p22_p1 = scmp.eq.s32.totalorder %s21_s14, 0  ;;  %p32_p2 = scmp.eq.s32.totalorder %s377_s9, 0 }
   0x9   : > { %p37_p3 = scmp.ne.s32.totalorder %s369_s7, %s365_s6  ;;  %p38_p4 = scmp.eq.s32.totalorder %s413_s10, 0 }
   0xa   : > { %s429_s15 = scalar_select %p22_p1, %s373_s8, %s24_s13  }
   0xb   : > { %p431_p5 = por %p32_p2, %p31_p0  ;;  %p435_p6 = por %p38_p4, %p37_p3 }
   0xc   : > { %p61_p7 = scmp.eq.s32.totalorder %s413_s10, 1  ;;  %p67_p8 = scmp.eq.s32.totalorder %s221_s11, 1 }
   0xd   : > { %p246_p10 = scmp.lt.s32.totalorder %s377_s9, 2  ;;  %s87_s20 = sand.u32 1, %s373_s8  }
   0xe   : > { %p442_p11 = por %p61_p7, %p31_p0  ;;  %p446_p12 = por %p67_p8, %p37_p3 }
   0xf   : > { %s225_s21 = sshll.u32 %s377_s9, 7  ;;  %s224_s22 = sshll.u32 %s87_s20, 3 }
  0x10   : > { %s558_s18 = scalar_select %p442_p11, 1, 0 }
  0x11   : > { %s559_s19 = scalar_select %p446_p12, 1, 0 }
  0x12   : > { %s455_s25 = scalar_lea.hbm %s553_s0, %s225_s21  ;;  %s91_s26 = scalar_lea.vmem [#allocation2], %s224_s22 }
  0x13   : > { %s98_s27 = sshll.u32 %s91_s26, 4  ;;  %p459_p13 = pnand %p246_p10, %p431_p5  ;;  %s463_s27 = int_to_ptr.vmem [resolvable:$true] %s98_s27 }
  0x14   : > { %s88_s29 = scalar_lea.sflag [#allocation3], %s87_s20  ;;  %s281_s30 = scalar_lea.hbm %s455_s25, 128 }
  0x15   : > { %p282_p2 = scmp.ne.s32.totalorder %s455_s25, %s281_s30  ;;  %p283_p3 = pneg %p459_p13 }
  0x16   : > { %s286_s4 = scalar_lea.hbm %s553_s0, 256  ;;  %p287_p5 = scmp.lt.u32.totalorder %s455_s25, %s553_s0 }
  0x17   : > { %p284_p4 = pnand %p283_p3, %p282_p2  ;;  %p288_p8 = scmp.lt.u32.totalorder %s286_s4, %s281_s30 }
  0x18   : > { %p290_p9 = scmp.lt.u32.totalorder %s281_s30, %s455_s25 }
  0x19   : > { %p285_p7 = pneg %p284_p4  ;;  %p289_p10 = por %p288_p8, %p287_p5 }
  0x1b   : > { %p291_p0 = por %p290_p9, %p289_p10 }
  0x1d   : > { %p292_p1 = pnand %p291_p0, %p285_p7 }
  0x1f   : > { %295 = shalt.err (!%p292_p1)
}
  0x20   : > { %s296_s13 = scalar_lea.vmem %s463_s27, 128  ;;  %s379_s14 = smov [#allocation2]  }
  0x21   : > { %p297_p2 = scmp.ne.s32.totalorder %s463_s27, %s296_s13  ;;  %s301_s16 = sshll.u32 %s379_s14, 4  ;;  %s302_s16 = int_to_ptr.vmem [resolvable:$false] %s301_s16 }
  0x22   : > { %s303_s20 = scalar_lea.vmem %s302_s16, 256  ;;  %p304_p11 = scmp.lt.s32.totalorder %s463_s27, %s302_s16 }
  0x23   : > { %p299_p4 = pnand %p297_p2, %p283_p3  ;;  %p305_p5 = scmp.lt.s32.totalorder %s303_s20, %s296_s13 }
  0x25   : > { %p300_p12 = pneg %p299_p4  ;;  %p306_p8 = por %p305_p5, %p304_p11 }
  0x27   : > { %p307_p9 = pnand %p306_p8, %p300_p12 }
  0x29   : > { %310 = shalt.err (!%p307_p9)
}
  0x2a   : > { %241 = dma.hbm_to_vmem [thread:$0]  (!%p459_p13), %s455_s25, 128, %s463_s27, %s88_s29  }
  0x2b   : > { %p561_p0 = scmp.lt.s32.totalorder %s377_s9, 3  ;;  %p562_p1 = scmp.ge.s32.totalorder %s377_s9, 1 }
  0x2d   : > { %p104_p3 = pnand %p562_p1, %p561_p0 }
  0x2e   : > { %s497_s21 = sand.u32 (!%p104_p3), 1, %s369_s7  }
  0x2f   : > { %107 = sbr.rel (%p104_p3) target bundleno = 81 (0x51), region = 24  ;;  %s227_s22 = sshll.u32 (!%p104_p3), %s497_s21, 3 }
  0x30   : > { %s110_s23 = scalar_lea.sflag (!%p104_p3), [#allocation3], %s497_s21  ;;  %s113_s24 = scalar_lea.vmem (!%p104_p3), [#allocation2], %s227_s22 }
  0x36   : > { %356 = dma.done.wait (%p435_p6), %s110_s23, 128  }
  0x37   : > { %358 = vsyncadd (%p435_p6), %s110_s23, 4294967168  ;;  %s131_s25 = scalar_lea.vmem [#allocation5], %s227_s22  ;;  %s231_s27 = sshll.u32 %s413_s10, 7  ;;  %v132_v0 = vld [vmem:[%s113_s24] sm:$0xff]  ;;  %v380_v1 = vmov 0.0  }
  0x38   : > { %s151_s26 = sshll.u32 %s131_s25, 4  ;;  %vm133_vm0 = vcmp.ge.f32.partialorder %v132_v0, 1.0  ;;  %s511_s30 = scalar_lea.hbm %s554_s1, %s231_s27  ;;  %s506_s26 = int_to_ptr.vmem [resolvable:$true] %s151_s26 }
  0x39   : > { %v229_v2 = vsel %vm133_vm0, 1.0, %v380_v1  ;;  %s138_s17 = scalar_lea.sflag [#allocation4], %s497_s21  ;;  %s311_s2 = scalar_lea.vmem %s506_s26, 128 }
  0x3a   : > { %136 = vst [vmem:[%s131_s25] sm:$0xff] %v229_v2  ;;  %p312_p6 = scmp.ne.s32.totalorder %s506_s26, %s311_s2  ;;  %p563_p11 = scmp.ne.s32.totalorder %s558_s18, 0 }
  0x3b   : > { %s381_s10 = smov [#allocation5]  }
  0x3c   : > { %p313_p12 = pnand %p312_p6, %p563_p11  ;;  %s315_s3 = sshll.u32 %s381_s10, 4  ;;  %s316_s3 = int_to_ptr.vmem [resolvable:$false] %s315_s3 }
  0x3d   : > { %s317_s4 = scalar_lea.vmem %s316_s3, 256  ;;  %p318_p7 = scmp.lt.s32.totalorder %s506_s26, %s316_s3 }
  0x3e   : > { %p314_p13 = pneg %p313_p12  ;;  %p319_p10 = scmp.lt.s32.totalorder %s317_s4, %s311_s2 }
  0x40   : > { %p320_p2 = por %p319_p10, %p318_p7 }
  0x42   : > { %p321_p4 = pnand %p320_p2, %p314_p13 }
  0x44   : > { %324 = shalt.err (!%p321_p4)
}
  0x45   : > { %s325_s5 = scalar_lea.hbm %s511_s30, 128  ;;  %s329_s14 = scalar_lea.hbm %s554_s1, 256 }
  0x46   : > { %p326_p5 = scmp.ne.s32.totalorder %s511_s30, %s325_s5  ;;  %p330_p0 = scmp.lt.u32.totalorder %s511_s30, %s554_s1 }
  0x47   : > { %p331_p1 = scmp.lt.u32.totalorder %s329_s14, %s325_s5  ;;  %p333_p6 = scmp.lt.u32.totalorder %s325_s5, %s511_s30 }
  0x48   : > { %p327_p8 = pnand %p326_p5, %p563_p11 }
  0x49   : > { %p332_p3 = por %p331_p1, %p330_p0 }
  0x4a   : > { %p328_p9 = pneg %p327_p8 }
  0x4b   : > { %p334_p12 = por %p333_p6, %p332_p3 }
  0x4d   : > { %p335_p13 = pnand %p334_p12, %p328_p9 }
  0x4f   : > { %338 = shalt.err (!%p335_p13)
}
  0x50   : > { %236 = dma.vmem_to_hbm [thread:$0]  (%p563_p11), %s506_s26, 128, %s511_s30, %s138_s17  }
  0x51 PF: > { %s163_s21 = sand.u32 1, %s365_s6   ;;  %p564_p7 = scmp.ne.s32.totalorder %s559_s19, 0 }
  0x52   : > { %p565_p10 = scmp.ge.s32.totalorder %s377_s9, 2  ;;  %s164_s22 = scalar_lea.sflag [#allocation4], %s163_s21 }
  0x54   : > { %p243_p2 = pnand %p565_p10, %p564_p7 }
  0x56   : > { %360 = dma.done.wait (!%p243_p2), %s164_s22, 128  }
  0x57   : > { %362 = vsyncadd (!%p243_p2), %s164_s22, 4294967168  ;;  %p14_p4 = scmp.ge.s32.totalorder %s417_s12, 4   ;;  %s566_s6 = smov %s369_s7 }
  0x58   : > { %s567_s7 = smov %s373_s8  ;;  %s568_s8 = smov %s429_s15 }
  0x59   : > { %s569_s9 = smov %s417_s12  ;;  %16 = sbr.rel (!%p14_p4) target bundleno = 5 (0x5), region = 69 }
  0x60   :  { %169 = vsyncpa [#allocation3], 1 }
  0x61   :  { %171 = vsyncpa [#allocation3 + $0x1], 1 }
  0x62   :  { %172 = vsyncpa [#allocation4], 1 }
  0x63   :  { %174 = vsyncpa [#allocation4 + $0x1], 1 }

</bundles_post_ra>
